<compile_context>
chip_gen: v5e
topology: v5e:2x2
jax: 0.10.0
libtpu: 0.0.40
codegen_flags: <defaults>
</compile_context>

<pallas_src>
from functools import partial

import jax
import jax.numpy as jnp
from jax.experimental import pallas as pl
from jax.experimental.pallas import tpu as pltpu


def vit_attention_kernel(x_ref, gamma_ref, beta_ref, wqkv_ref, wout_ref, bout_ref,
                         o_ref, xn_ref, acc_ref, *,
                         group, dim_head, eps, bt, n):
    g = pl.program_id(1)
    rows = bt * n
    gdh = group * dim_head
    mm_dtype = xn_ref.dtype   # matmul-input dtype (== weight dtype; bf16-capable)

    # ---- once per batch tile: LayerNorm (f32 math) + accumulator init ----
    @pl.when(g == 0)
    def _():
        x = x_ref[...].reshape(rows, -1).astype(jnp.float32)
        mean = jnp.mean(x, axis=-1, keepdims=True)
        var = jnp.mean(jnp.square(x - mean), axis=-1, keepdims=True)
        xn = (x - mean) * jax.lax.rsqrt(var + eps)
        xn = xn * gamma_ref[...].astype(jnp.float32) + beta_ref[...].astype(jnp.float32)
        xn_ref[...] = xn.astype(mm_dtype)
        acc_ref[...] = jnp.zeros_like(acc_ref)

    xm = xn_ref[...]                                              # (rows, D)

    # ---- fused QKV projection for this head group (lane-dense N = 3*G*dh) ----
    # Column layout (wrapper relayout): [q_h0..q_h{G-1} | k_h0.. | v_h0..].
    qkv = jnp.dot(xm, wqkv_ref[0], preferred_element_type=jnp.float32)

    # ---- per-head softmax attention (small static loop over the group) ----
    ctx_parts = []
    for h in range(group):
        q = qkv[:, h * dim_head:(h + 1) * dim_head]
        k = qkv[:, gdh + h * dim_head:gdh + (h + 1) * dim_head]
        v = qkv[:, 2 * gdh + h * dim_head:2 * gdh + (h + 1) * dim_head]
        q3 = q.reshape(bt, n, dim_head).astype(mm_dtype)
        k3 = k.reshape(bt, n, dim_head).astype(mm_dtype)
        v3 = v.reshape(bt, n, dim_head).astype(mm_dtype)

        s = jnp.einsum("bnd,bmd->bnm", q3, k3,
                       preferred_element_type=jnp.float32)        # (bt, n, n)
        s = s - jnp.max(s, axis=-1, keepdims=True)
        p = jnp.exp(s)                                            # f32 unnormalized probs
        inv_denom = pl.reciprocal(jnp.sum(p, axis=-1, keepdims=True), approx=True)
        ctx = jnp.einsum("bnm,bmd->bnd", p.astype(mm_dtype), v3,
                         preferred_element_type=jnp.float32)      # (bt, n, dh)
        ctx_parts.append(ctx * inv_denom)

    ctx_g = ctx_parts[0] if group == 1 else jnp.concatenate(ctx_parts, axis=-1)
    ctx_g = ctx_g.reshape(rows, gdh).astype(wout_ref.dtype)

    # ---- accumulate this group's slice of the output projection (K = G*dh) ----
    acc_ref[...] += jnp.dot(ctx_g, wout_ref[0], preferred_element_type=jnp.float32)

    # ---- last group: add bias and store the batch-tile output ----
    @pl.when(g == pl.num_programs(1) - 1)
    def _():
        y = acc_ref[...] + bout_ref[...].astype(jnp.float32)
        o_ref[...] = y.reshape(bt, n, -1).astype(o_ref.dtype)


def _pick_batch_tile(B, N, target_rows=256):
    """Largest divisor Bt of B such that Bt*N stays near the MXU M target."""
    best = 1
    for cand in range(1, B + 1):
        if B % cand == 0 and cand * N <= max(target_rows, N):
            best = cand
    return best


def _pick_head_group(heads, dim_head, target=128):
    """Largest divisor G of heads with G*dim_head <= max(target, dim_head)."""
    best = 1
    for cand in range(1, heads + 1):
        if heads % cand == 0 and cand * dim_head <= max(target, dim_head):
            best = cand
    return best


def vit_attention(x, gamma, beta, w_qkv, w_out, b_out, *, heads, dim_head,
                  block_b=None, head_group=None):
    B, N, D = x.shape
    inner = heads * dim_head
    assert w_qkv.shape == (D, 3 * inner)
    assert w_out.shape == (inner, D)

    Bt = _pick_batch_tile(B, N) if block_b is None else block_b
    G = _pick_head_group(heads, dim_head) if head_group is None else head_group
    assert B % Bt == 0 and heads % G == 0
    ngroups = heads // G
    rows = Bt * N
    gdh = G * dim_head
    scale = dim_head ** -0.5

    # Fold the softmax scale into the q columns (mathematically equivalent).
    w_qkv_s = w_qkv.at[:, :inner].multiply(scale)

    # Group-major weight re-layout (wrapper-side, once):
    #   w_qkv columns are [q | k | v], each heads*dh wide, head-major.
    #   -> (ngroups, D, 3*G*dh) with per-group columns [q_h0..q_h{G-1}|k..|v..]
    w_qkv_g = (w_qkv_s.reshape(D, 3, ngroups, G, dim_head)
                      .transpose(2, 0, 1, 3, 4)
                      .reshape(ngroups, D, 3 * gdh))
    #   w_out rows are grouped by head -> (ngroups, G*dh, D)
    w_out_g = w_out.reshape(ngroups, gdh, D)

    kernel = partial(vit_attention_kernel, group=G, dim_head=dim_head,
                     eps=1e-5, bt=Bt, n=N)

    return pl.pallas_call(
        kernel,
        out_shape=jax.ShapeDtypeStruct((B, N, D), x.dtype),
        grid_spec=pltpu.PrefetchScalarGridSpec(
            num_scalar_prefetch=0,
            grid=(B // Bt, ngroups),
            in_specs=[
                pl.BlockSpec((Bt, N, D), lambda b, g: (b, 0, 0)),         # x (resident over groups)
                pl.BlockSpec((1, D), lambda b, g: (0, 0)),                # gamma
                pl.BlockSpec((1, D), lambda b, g: (0, 0)),                # beta
                pl.BlockSpec((1, D, 3 * gdh), lambda b, g: (g, 0, 0)),    # fused QKV weights, group g
                pl.BlockSpec((1, gdh, D), lambda b, g: (g, 0, 0)),        # W_out rows, group g
                pl.BlockSpec((1, D), lambda b, g: (0, 0)),                # b_out
            ],
            out_specs=pl.BlockSpec((Bt, N, D), lambda b, g: (b, 0, 0)),
            scratch_shapes=[
                pltpu.VMEM((rows, D), w_qkv.dtype),    # LayerNorm'd activations (once per tile)
                pltpu.VMEM((rows, D), jnp.float32),    # out-proj accumulator over head groups
            ],
        ),
        compiler_params=pltpu.CompilerParams(
            dimension_semantics=("parallel", "arbitrary"),
            vmem_limit_bytes=32 * 1024 * 1024,
        ),
    )(x, gamma, beta, w_qkv_g, w_out_g, b_out)


def vit_attention_ref(x, gamma, beta, w_qkv, w_out, b_out, *, heads, dim_head):
    """Pure-JAX reference mirroring the PyTorch module."""
    B, N, D = x.shape
    inner = heads * dim_head
    mean = jnp.mean(x, axis=-1, keepdims=True)
    var = jnp.mean((x - mean) ** 2, axis=-1, keepdims=True)
    xn = (x - mean) / jnp.sqrt(var + 1e-5) * gamma[0] + beta[0]
    qkv = xn @ w_qkv                                               # (B, N, 3*inner)
    q, k, v = jnp.split(qkv, 3, axis=-1)

    def to_heads(t):
        return t.reshape(B, N, heads, dim_head).transpose(0, 2, 1, 3)

    q, k, v = map(to_heads, (q, k, v))
    dots = jnp.einsum("bhnd,bhmd->bhnm", q, k) * (dim_head ** -0.5)
    attn = jax.nn.softmax(dots, axis=-1)
    out = jnp.einsum("bhnm,bhmd->bhnd", attn, v)
    out = out.transpose(0, 2, 1, 3).reshape(B, N, inner)
    return out @ w_out + b_out[0]


if __name__ == "__main__":
    # Small config consistent with the module: dim=32, heads=4, dim_head=16.
    B, N, D = 2, 8, 32
    heads, dim_head = 4, 16
    inner = heads * dim_head

    key = jax.random.PRNGKey(0)
    kx, kq, ko, kb, kg, kbt = jax.random.split(key, 6)

    x = jax.random.normal(kx, (B, N, D), dtype=jnp.float32)
    # nn.Linear-style init (scaled uniform) done deterministically here.
    w_qkv = jax.random.uniform(kq, (D, 3 * inner), jnp.float32, -1, 1) * (D ** -0.5)
    w_out = jax.random.uniform(ko, (inner, D), jnp.float32, -1, 1) * (inner ** -0.5)
    b_out = jax.random.uniform(kb, (1, D), jnp.float32, -1, 1) * (inner ** -0.5)
    gamma = 1.0 + 0.1 * jax.random.normal(kg, (1, D), dtype=jnp.float32)
    beta = 0.1 * jax.random.normal(kbt, (1, D), dtype=jnp.float32)

    y = vit_attention(x, gamma, beta, w_qkv, w_out, b_out,
                      heads=heads, dim_head=dim_head)
    y = jax.block_until_ready(y)

    y_ref = vit_attention_ref(x, gamma, beta, w_qkv, w_out, b_out,
                              heads=heads, dim_head=dim_head)
    # Slightly looser tolerance than pure-f32: softmax denominator uses the
    # hardware approximate reciprocal (EUP vrcp) and scale is folded into W_q.
    assert jnp.allclose(y, y_ref, rtol=5e-3, atol=5e-3), "mismatch vs reference"

    print("KERNEL_OK")
</pallas_src>

<mosaic_0001>
module attributes {stable_mosaic.version = 11 : i64} {
  func.func @vit_attention_kernel(%arg0: i32, %arg1: i32, %arg2: memref<2x8x32xf32, #tpu.memory_space<vmem>>, %arg3: memref<1x32xf32, #tpu.memory_space<vmem>>, %arg4: memref<1x32xf32, #tpu.memory_space<vmem>>, %arg5: memref<1x32x192xf32, #tpu.memory_space<vmem>>, %arg6: memref<1x64x32xf32, #tpu.memory_space<vmem>>, %arg7: memref<1x32xf32, #tpu.memory_space<vmem>>, %arg8: memref<2x8x32xf32, #tpu.memory_space<vmem>>, %arg9: memref<16x32xf32, #tpu.memory_space<vmem>>, %arg10: memref<16x32xf32, #tpu.memory_space<vmem>>) attributes {dimension_semantics = [#tpu.dimension_semantics<parallel>, #tpu.dimension_semantics<arbitrary>], iteration_bounds = array<i64: 1, 1>, scalar_prefetch = 0 : i64, scratch_operands = 2 : i64, tpu.core_type = #tpu.core_type<tc>, window_params = [{transform_indices = @transform_0, window_bounds = array<i64: 2, 8, 32>}, {pipeline_mode = #tpu.pipeline_mode<synchronous>, transform_indices = @transform_1, window_bounds = array<i64: 1, 32>}, {pipeline_mode = #tpu.pipeline_mode<synchronous>, transform_indices = @transform_2, window_bounds = array<i64: 1, 32>}, {transform_indices = @transform_3, window_bounds = array<i64: 1, 32, 192>}, {transform_indices = @transform_4, window_bounds = array<i64: 1, 64, 32>}, {pipeline_mode = #tpu.pipeline_mode<synchronous>, transform_indices = @transform_5, window_bounds = array<i64: 1, 32>}, {transform_indices = @transform_6, window_bounds = array<i64: 2, 8, 32>}]} {
    %c0_i32 = arith.constant 0 : i32
    %0 = arith.cmpi eq, %arg1, %c0_i32 : i32
    %1 = arith.extui %0 : i1 to i32
    %c0_i32_0 = arith.constant 0 : i32
    %2 = arith.cmpi ne, %1, %c0_i32_0 : i32
    scf.if %2 {
      %c0_31 = arith.constant 0 : index
      %c0_32 = arith.constant 0 : index
      %c0_33 = arith.constant 0 : index
      %90 = vector.load %arg2[%c0_31, %c0_32, %c0_33] : memref<2x8x32xf32, #tpu.memory_space<vmem>>, vector<2x8x32xf32>
      %91 = vector.shape_cast %90 : vector<2x8x32xf32> to vector<16x32xf32>
      %cst_34 = arith.constant dense<0.000000e+00> : vector<16xf32>
      %92 = vector.multi_reduction <add>, %91, %cst_34 [1] : vector<16x32xf32> to vector<16xf32>
      %93 = vector.shape_cast %92 : vector<16xf32> to vector<16x1xf32>
      %cst_35 = arith.constant 3.200000e+01 : f32
      %94 = vector.broadcast %cst_35 : f32 to vector<16x1xf32>
      %95 = arith.divf %93, %94 : vector<16x1xf32>
      %96 = vector.broadcast %95 : vector<16x1xf32> to vector<16x32xf32>
      %97 = arith.subf %91, %96 : vector<16x32xf32>
      %98 = arith.mulf %97, %97 : vector<16x32xf32>
      %cst_36 = arith.constant dense<0.000000e+00> : vector<16xf32>
      %99 = vector.multi_reduction <add>, %98, %cst_36 [1] : vector<16x32xf32> to vector<16xf32>
      %100 = vector.shape_cast %99 : vector<16xf32> to vector<16x1xf32>
      %cst_37 = arith.constant 3.200000e+01 : f32
      %101 = vector.broadcast %cst_37 : f32 to vector<16x1xf32>
      %102 = arith.divf %100, %101 : vector<16x1xf32>
      %103 = vector.broadcast %95 : vector<16x1xf32> to vector<16x32xf32>
      %104 = arith.subf %91, %103 : vector<16x32xf32>
      %cst_38 = arith.constant 9.99999974E-6 : f32
      %105 = vector.broadcast %cst_38 : f32 to vector<16x1xf32>
      %106 = arith.addf %102, %105 : vector<16x1xf32>
      %107 = math.rsqrt %106 : vector<16x1xf32>
      %108 = vector.broadcast %107 : vector<16x1xf32> to vector<16x32xf32>
      %109 = arith.mulf %104, %108 : vector<16x32xf32>
      %c0_39 = arith.constant 0 : index
      %c0_40 = arith.constant 0 : index
      %110 = vector.load %arg3[%c0_39, %c0_40] : memref<1x32xf32, #tpu.memory_space<vmem>>, vector<1x32xf32>
      %111 = vector.broadcast %110 : vector<1x32xf32> to vector<16x32xf32>
      %112 = arith.mulf %109, %111 : vector<16x32xf32>
      %c0_41 = arith.constant 0 : index
      %c0_42 = arith.constant 0 : index
      %113 = vector.load %arg4[%c0_41, %c0_42] : memref<1x32xf32, #tpu.memory_space<vmem>>, vector<1x32xf32>
      %114 = vector.broadcast %113 : vector<1x32xf32> to vector<16x32xf32>
      %115 = arith.addf %112, %114 : vector<16x32xf32>
      %c0_43 = arith.constant 0 : index
      %c0_44 = arith.constant 0 : index
      %116 = vector.load %arg9[%c0_43, %c0_44] : memref<16x32xf32, #tpu.memory_space<vmem>>, vector<16x32xf32>
      tpu.vector_store %arg9[%c0_43, %c0_44], %115 {strides = array<i32>} : memref<16x32xf32, #tpu.memory_space<vmem>>, vector<16x32xf32>,
      %cst_45 = arith.constant 0.000000e+00 : f32
      %117 = vector.broadcast %cst_45 : f32 to vector<16x32xf32>
      %c0_46 = arith.constant 0 : index
      %c0_47 = arith.constant 0 : index
      %118 = vector.load %arg10[%c0_46, %c0_47] : memref<16x32xf32, #tpu.memory_space<vmem>>, vector<16x32xf32>
      tpu.vector_store %arg10[%c0_46, %c0_47], %117 {strides = array<i32>} : memref<16x32xf32, #tpu.memory_space<vmem>>, vector<16x32xf32>,
    } else {
    }
    %c0 = arith.constant 0 : index
    %c0_1 = arith.constant 0 : index
    %3 = vector.load %arg9[%c0, %c0_1] : memref<16x32xf32, #tpu.memory_space<vmem>>, vector<16x32xf32>
    %c0_2 = arith.constant 0 : index
    %c0_3 = arith.constant 0 : index
    %c0_4 = arith.constant 0 : index
    %4 = vector.load %arg5[%c0_2, %c0_3, %c0_4] : memref<1x32x192xf32, #tpu.memory_space<vmem>>, vector<1x32x192xf32>
    %5 = vector.shape_cast %4 : vector<1x32x192xf32> to vector<32x192xf32>
    %cst = arith.constant dense<0.000000e+00> : vector<16x192xf32>
    %6 = tpu.matmul %3, %5, %cst {dimension_numbers = #tpu.dot_dimension_numbers<[1], [0], [0], [1], [0, 0, 1, 1], [], []>} : vector<16x32xf32>, vector<32x192xf32>, vector<16x192xf32> -> vector<16x192xf32>
    %7 = vector.extract_strided_slice %6 {offsets = [0, 0], sizes = [16, 16], strides = [1, 1]} : vector<16x192xf32> to vector<16x16xf32>
    %8 = vector.extract_strided_slice %6 {offsets = [0, 64], sizes = [16, 16], strides = [1, 1]} : vector<16x192xf32> to vector<16x16xf32>
    %9 = vector.extract_strided_slice %6 {offsets = [0, 128], sizes = [16, 16], strides = [1, 1]} : vector<16x192xf32> to vector<16x16xf32>
    %10 = vector.shape_cast %7 : vector<16x16xf32> to vector<2x8x16xf32>
    %11 = vector.shape_cast %8 : vector<16x16xf32> to vector<2x8x16xf32>
    %12 = vector.shape_cast %9 : vector<16x16xf32> to vector<2x8x16xf32>
    "tpu.trace_start"() <{level = 10 : i32, message = "bnd,bmd->bnm"}> : () -> ()
    %cst_5 = arith.constant dense<0.000000e+00> : vector<2x8x8xf32>
    %13 = tpu.matmul %10, %11, %cst_5 {dimension_numbers = #tpu.dot_dimension_numbers<[2], [2], [1], [1], [0, 0, 0, 1, 1, 1], [0], [0]>} : vector<2x8x16xf32>, vector<2x8x16xf32>, vector<2x8x8xf32> -> vector<2x8x8xf32>
    "tpu.trace_stop"() : () -> ()
    %cst_6 = arith.constant dense<0xFF800000> : vector<2x8xf32>
    %14 = vector.multi_reduction <maximumf>, %13, %cst_6 [2] : vector<2x8x8xf32> to vector<2x8xf32>
    %15 = vector.shape_cast %14 : vector<2x8xf32> to vector<2x8x1xf32>
    %16 = vector.broadcast %15 : vector<2x8x1xf32> to vector<2x8x8xf32>
    %17 = arith.subf %13, %16 : vector<2x8x8xf32>
    %18 = math.exp %17 : vector<2x8x8xf32>
    %cst_7 = arith.constant dense<0.000000e+00> : vector<2x8xf32>
    %19 = vector.multi_reduction <add>, %18, %cst_7 [2] : vector<2x8x8xf32> to vector<2x8xf32>
    %20 = vector.shape_cast %19 : vector<2x8xf32> to vector<2x8x1xf32>
    %21 = tpu.reciprocal %20 {approx = true} : vector<2x8x1xf32> -> vector<2x8x1xf32>
    "tpu.trace_start"() <{level = 10 : i32, message = "bnm,bmd->bnd"}> : () -> ()
    %cst_8 = arith.constant dense<0.000000e+00> : vector<2x8x16xf32>
    %22 = tpu.matmul %18, %12, %cst_8 {dimension_numbers = #tpu.dot_dimension_numbers<[2], [1], [1], [2], [0, 0, 0, 1, 1, 2], [0], [0]>} : vector<2x8x8xf32>, vector<2x8x16xf32>, vector<2x8x16xf32> -> vector<2x8x16xf32>
    "tpu.trace_stop"() : () -> ()
    %23 = vector.broadcast %21 : vector<2x8x1xf32> to vector<2x8x16xf32>
    %24 = arith.mulf %22, %23 : vector<2x8x16xf32>
    %25 = vector.extract_strided_slice %6 {offsets = [0, 16], sizes = [16, 16], strides = [1, 1]} : vector<16x192xf32> to vector<16x16xf32>
    %26 = vector.extract_strided_slice %6 {offsets = [0, 80], sizes = [16, 16], strides = [1, 1]} : vector<16x192xf32> to vector<16x16xf32>
    %27 = vector.extract_strided_slice %6 {offsets = [0, 144], sizes = [16, 16], strides = [1, 1]} : vector<16x192xf32> to vector<16x16xf32>
    %28 = vector.shape_cast %25 : vector<16x16xf32> to vector<2x8x16xf32>
    %29 = vector.shape_cast %26 : vector<16x16xf32> to vector<2x8x16xf32>
    %30 = vector.shape_cast %27 : vector<16x16xf32> to vector<2x8x16xf32>
    "tpu.trace_start"() <{level = 10 : i32, message = "bnd,bmd->bnm"}> : () -> ()
    %cst_9 = arith.constant dense<0.000000e+00> : vector<2x8x8xf32>
    %31 = tpu.matmul %28, %29, %cst_9 {dimension_numbers = #tpu.dot_dimension_numbers<[2], [2], [1], [1], [0, 0, 0, 1, 1, 1], [0], [0]>} : vector<2x8x16xf32>, vector<2x8x16xf32>, vector<2x8x8xf32> -> vector<2x8x8xf32>
    "tpu.trace_stop"() : () -> ()
    %cst_10 = arith.constant dense<0xFF800000> : vector<2x8xf32>
    %32 = vector.multi_reduction <maximumf>, %31, %cst_10 [2] : vector<2x8x8xf32> to vector<2x8xf32>
    %33 = vector.shape_cast %32 : vector<2x8xf32> to vector<2x8x1xf32>
    %34 = vector.broadcast %33 : vector<2x8x1xf32> to vector<2x8x8xf32>
    %35 = arith.subf %31, %34 : vector<2x8x8xf32>
    %36 = math.exp %35 : vector<2x8x8xf32>
    %cst_11 = arith.constant dense<0.000000e+00> : vector<2x8xf32>
    %37 = vector.multi_reduction <add>, %36, %cst_11 [2] : vector<2x8x8xf32> to vector<2x8xf32>
    %38 = vector.shape_cast %37 : vector<2x8xf32> to vector<2x8x1xf32>
    %39 = tpu.reciprocal %38 {approx = true} : vector<2x8x1xf32> -> vector<2x8x1xf32>
    "tpu.trace_start"() <{level = 10 : i32, message = "bnm,bmd->bnd"}> : () -> ()
    %cst_12 = arith.constant dense<0.000000e+00> : vector<2x8x16xf32>
    %40 = tpu.matmul %36, %30, %cst_12 {dimension_numbers = #tpu.dot_dimension_numbers<[2], [1], [1], [2], [0, 0, 0, 1, 1, 2], [0], [0]>} : vector<2x8x8xf32>, vector<2x8x16xf32>, vector<2x8x16xf32> -> vector<2x8x16xf32>
    "tpu.trace_stop"() : () -> ()
    %41 = vector.broadcast %39 : vector<2x8x1xf32> to vector<2x8x16xf32>
    %42 = arith.mulf %40, %41 : vector<2x8x16xf32>
    %43 = vector.extract_strided_slice %6 {offsets = [0, 32], sizes = [16, 16], strides = [1, 1]} : vector<16x192xf32> to vector<16x16xf32>
    %44 = vector.extract_strided_slice %6 {offsets = [0, 96], sizes = [16, 16], strides = [1, 1]} : vector<16x192xf32> to vector<16x16xf32>
    %45 = vector.extract_strided_slice %6 {offsets = [0, 160], sizes = [16, 16], strides = [1, 1]} : vector<16x192xf32> to vector<16x16xf32>
    %46 = vector.shape_cast %43 : vector<16x16xf32> to vector<2x8x16xf32>
    %47 = vector.shape_cast %44 : vector<16x16xf32> to vector<2x8x16xf32>
    %48 = vector.shape_cast %45 : vector<16x16xf32> to vector<2x8x16xf32>
    "tpu.trace_start"() <{level = 10 : i32, message = "bnd,bmd->bnm"}> : () -> ()
    %cst_13 = arith.constant dense<0.000000e+00> : vector<2x8x8xf32>
    %49 = tpu.matmul %46, %47, %cst_13 {dimension_numbers = #tpu.dot_dimension_numbers<[2], [2], [1], [1], [0, 0, 0, 1, 1, 1], [0], [0]>} : vector<2x8x16xf32>, vector<2x8x16xf32>, vector<2x8x8xf32> -> vector<2x8x8xf32>
    "tpu.trace_stop"() : () -> ()
    %cst_14 = arith.constant dense<0xFF800000> : vector<2x8xf32>
    %50 = vector.multi_reduction <maximumf>, %49, %cst_14 [2] : vector<2x8x8xf32> to vector<2x8xf32>
    %51 = vector.shape_cast %50 : vector<2x8xf32> to vector<2x8x1xf32>
    %52 = vector.broadcast %51 : vector<2x8x1xf32> to vector<2x8x8xf32>
    %53 = arith.subf %49, %52 : vector<2x8x8xf32>
    %54 = math.exp %53 : vector<2x8x8xf32>
    %cst_15 = arith.constant dense<0.000000e+00> : vector<2x8xf32>
    %55 = vector.multi_reduction <add>, %54, %cst_15 [2] : vector<2x8x8xf32> to vector<2x8xf32>
    %56 = vector.shape_cast %55 : vector<2x8xf32> to vector<2x8x1xf32>
    %57 = tpu.reciprocal %56 {approx = true} : vector<2x8x1xf32> -> vector<2x8x1xf32>
    "tpu.trace_start"() <{level = 10 : i32, message = "bnm,bmd->bnd"}> : () -> ()
    %cst_16 = arith.constant dense<0.000000e+00> : vector<2x8x16xf32>
    %58 = tpu.matmul %54, %48, %cst_16 {dimension_numbers = #tpu.dot_dimension_numbers<[2], [1], [1], [2], [0, 0, 0, 1, 1, 2], [0], [0]>} : vector<2x8x8xf32>, vector<2x8x16xf32>, vector<2x8x16xf32> -> vector<2x8x16xf32>
    "tpu.trace_stop"() : () -> ()
    %59 = vector.broadcast %57 : vector<2x8x1xf32> to vector<2x8x16xf32>
    %60 = arith.mulf %58, %59 : vector<2x8x16xf32>
    %61 = vector.extract_strided_slice %6 {offsets = [0, 48], sizes = [16, 16], strides = [1, 1]} : vector<16x192xf32> to vector<16x16xf32>
    %62 = vector.extract_strided_slice %6 {offsets = [0, 112], sizes = [16, 16], strides = [1, 1]} : vector<16x192xf32> to vector<16x16xf32>
    %63 = vector.extract_strided_slice %6 {offsets = [0, 176], sizes = [16, 16], strides = [1, 1]} : vector<16x192xf32> to vector<16x16xf32>
    %64 = vector.shape_cast %61 : vector<16x16xf32> to vector<2x8x16xf32>
    %65 = vector.shape_cast %62 : vector<16x16xf32> to vector<2x8x16xf32>
    %66 = vector.shape_cast %63 : vector<16x16xf32> to vector<2x8x16xf32>
    "tpu.trace_start"() <{level = 10 : i32, message = "bnd,bmd->bnm"}> : () -> ()
    %cst_17 = arith.constant dense<0.000000e+00> : vector<2x8x8xf32>
    %67 = tpu.matmul %64, %65, %cst_17 {dimension_numbers = #tpu.dot_dimension_numbers<[2], [2], [1], [1], [0, 0, 0, 1, 1, 1], [0], [0]>} : vector<2x8x16xf32>, vector<2x8x16xf32>, vector<2x8x8xf32> -> vector<2x8x8xf32>
    "tpu.trace_stop"() : () -> ()
    %cst_18 = arith.constant dense<0xFF800000> : vector<2x8xf32>
    %68 = vector.multi_reduction <maximumf>, %67, %cst_18 [2] : vector<2x8x8xf32> to vector<2x8xf32>
    %69 = vector.shape_cast %68 : vector<2x8xf32> to vector<2x8x1xf32>
    %70 = vector.broadcast %69 : vector<2x8x1xf32> to vector<2x8x8xf32>
    %71 = arith.subf %67, %70 : vector<2x8x8xf32>
    %72 = math.exp %71 : vector<2x8x8xf32>
    %cst_19 = arith.constant dense<0.000000e+00> : vector<2x8xf32>
    %73 = vector.multi_reduction <add>, %72, %cst_19 [2] : vector<2x8x8xf32> to vector<2x8xf32>
    %74 = vector.shape_cast %73 : vector<2x8xf32> to vector<2x8x1xf32>
    %75 = tpu.reciprocal %74 {approx = true} : vector<2x8x1xf32> -> vector<2x8x1xf32>
    "tpu.trace_start"() <{level = 10 : i32, message = "bnm,bmd->bnd"}> : () -> ()
    %cst_20 = arith.constant dense<0.000000e+00> : vector<2x8x16xf32>
    %76 = tpu.matmul %72, %66, %cst_20 {dimension_numbers = #tpu.dot_dimension_numbers<[2], [1], [1], [2], [0, 0, 0, 1, 1, 2], [0], [0]>} : vector<2x8x8xf32>, vector<2x8x16xf32>, vector<2x8x16xf32> -> vector<2x8x16xf32>
    "tpu.trace_stop"() : () -> ()
    %77 = vector.broadcast %75 : vector<2x8x1xf32> to vector<2x8x16xf32>
    %78 = arith.mulf %76, %77 : vector<2x8x16xf32>
    %79 = tpu.concatenate %24, %42, %60, %78 in 2 : vector<2x8x16xf32>, vector<2x8x16xf32>, vector<2x8x16xf32>, vector<2x8x16xf32> -> vector<2x8x64xf32>
    %80 = vector.shape_cast %79 : vector<2x8x64xf32> to vector<16x64xf32>
    %c0_21 = arith.constant 0 : index
    %c0_22 = arith.constant 0 : index
    %81 = vector.load %arg10[%c0_21, %c0_22] : memref<16x32xf32, #tpu.memory_space<vmem>>, vector<16x32xf32>
    %c0_23 = arith.constant 0 : index
    %c0_24 = arith.constant 0 : index
    %c0_25 = arith.constant 0 : index
    %82 = vector.load %arg6[%c0_23, %c0_24, %c0_25] : memref<1x64x32xf32, #tpu.memory_space<vmem>>, vector<1x64x32xf32>
    %83 = vector.shape_cast %82 : vector<1x64x32xf32> to vector<64x32xf32>
    %cst_26 = arith.constant dense<0.000000e+00> : vector<16x32xf32>
    %84 = tpu.matmul %80, %83, %cst_26 {dimension_numbers = #tpu.dot_dimension_numbers<[1], [0], [0], [1], [0, 0, 1, 1], [], []>} : vector<16x64xf32>, vector<64x32xf32>, vector<16x32xf32> -> vector<16x32xf32>
    %85 = arith.addf %81, %84 : vector<16x32xf32>
    %c0_27 = arith.constant 0 : index
    %c0_28 = arith.constant 0 : index
    %86 = vector.load %arg10[%c0_27, %c0_28] : memref<16x32xf32, #tpu.memory_space<vmem>>, vector<16x32xf32>
    tpu.vector_store %arg10[%c0_27, %c0_28], %85 {strides = array<i32>} : memref<16x32xf32, #tpu.memory_space<vmem>>, vector<16x32xf32>,
    %c0_i32_29 = arith.constant 0 : i32
    %87 = arith.cmpi eq, %arg1, %c0_i32_29 : i32
    %88 = arith.extui %87 : i1 to i32
    %c0_i32_30 = arith.constant 0 : i32
    %89 = arith.cmpi ne, %88, %c0_i32_30 : i32
    scf.if %89 {
      %c0_31 = arith.constant 0 : index
      %c0_32 = arith.constant 0 : index
      %90 = vector.load %arg10[%c0_31, %c0_32] : memref<16x32xf32, #tpu.memory_space<vmem>>, vector<16x32xf32>
      %c0_33 = arith.constant 0 : index
      %c0_34 = arith.constant 0 : index
      %91 = vector.load %arg7[%c0_33, %c0_34] : memref<1x32xf32, #tpu.memory_space<vmem>>, vector<1x32xf32>
      %92 = vector.broadcast %91 : vector<1x32xf32> to vector<16x32xf32>
      %93 = arith.addf %90, %92 : vector<16x32xf32>
      %94 = vector.shape_cast %93 : vector<16x32xf32> to vector<2x8x32xf32>
      %c0_35 = arith.constant 0 : index
      %c0_36 = arith.constant 0 : index
      %c0_37 = arith.constant 0 : index
      %95 = vector.load %arg8[%c0_35, %c0_36, %c0_37] : memref<2x8x32xf32, #tpu.memory_space<vmem>>, vector<2x8x32xf32>
      tpu.vector_store %arg8[%c0_35, %c0_36, %c0_37], %94 {strides = array<i32>} : memref<2x8x32xf32, #tpu.memory_space<vmem>>, vector<2x8x32xf32>,
    } else {
    }
    return
  }
  func.func @transform_0(%arg0: i32, %arg1: i32) -> (i32, i32, i32) {
    %c0_i32 = arith.constant 0 : i32
    %c0_i32_0 = arith.constant 0 : i32
    %c0_i32_1 = arith.constant 0 : i32
    return %arg0, %c0_i32, %c0_i32_0 : i32, i32, i32
  }
  func.func @transform_1(%arg0: i32, %arg1: i32) -> (i32, i32) {
    %c0_i32 = arith.constant 0 : i32
    %c0_i32_0 = arith.constant 0 : i32
    %c0_i32_1 = arith.constant 0 : i32
    return %c0_i32, %c0_i32_0 : i32, i32
  }
  func.func @transform_2(%arg0: i32, %arg1: i32) -> (i32, i32) {
    %c0_i32 = arith.constant 0 : i32
    %c0_i32_0 = arith.constant 0 : i32
    %c0_i32_1 = arith.constant 0 : i32
    return %c0_i32, %c0_i32_0 : i32, i32
  }
  func.func @transform_3(%arg0: i32, %arg1: i32) -> (i32, i32, i32) {
    %c0_i32 = arith.constant 0 : i32
    %c0_i32_0 = arith.constant 0 : i32
    %c0_i32_1 = arith.constant 0 : i32
    return %arg1, %c0_i32, %c0_i32_0 : i32, i32, i32
  }
  func.func @transform_4(%arg0: i32, %arg1: i32) -> (i32, i32, i32) {
    %c0_i32 = arith.constant 0 : i32
    %c0_i32_0 = arith.constant 0 : i32
    %c0_i32_1 = arith.constant 0 : i32
    return %arg1, %c0_i32, %c0_i32_0 : i32, i32, i32
  }
  func.func @transform_5(%arg0: i32, %arg1: i32) -> (i32, i32) {
    %c0_i32 = arith.constant 0 : i32
    %c0_i32_0 = arith.constant 0 : i32
    %c0_i32_1 = arith.constant 0 : i32
    return %c0_i32, %c0_i32_0 : i32, i32
  }
  func.func @transform_6(%arg0: i32, %arg1: i32) -> (i32, i32, i32) {
    %c0_i32 = arith.constant 0 : i32
    %c0_i32_0 = arith.constant 0 : i32
    %c0_i32_1 = arith.constant 0 : i32
    return %arg0, %c0_i32, %c0_i32_0 : i32, i32, i32
  }
}

</mosaic_0001>

<bundles_post_ra>
// kernel: tpu_custom_call.1
= control target key start
LH: loop header
LB: loop body
LE: loop exit
PB: predicated region body
PF: predicated region fallthrough
CT: control target
= control target key end

     0   :  { %vm30_vm0 = vcmask 261120   ;;  %s1117_s0 = inlined_call_operand.vmem [shape: f32[2,8,32], index: 0, kind: input, shape index: {}]   ;;  %s1118_s1 = inlined_call_operand.vmem [shape: f32[1,32], index: 1, kind: input, shape index: {}]   ;;  %s1119_s2 = inlined_call_operand.vmem [shape: f32[1,32], index: 2, kind: input, shape index: {}]   ;;  %s1120_s3 = inlined_call_operand.vmem [shape: f32[1,32,192], index: 3, kind: input, shape index: {}]   ;;  %s1121_s4 = inlined_call_operand.vmem [shape: f32[1,64,32], index: 4, kind: input, shape index: {}]   ;;  %s1122_s5 = inlined_call_operand.vmem [shape: f32[1,32], index: 5, kind: input, shape index: {}]   ;;  %s1123_s6 = inlined_call_operand.hbm [shape: f32[2,8,32], index: 6, kind: output, shape index: {}]  }
   0x1   :  { %v28_v0 = vld [vmem:[%s1117_s0] sm:$0xff] }
   0x2   :  { %v31_v1 = vsel %vm30_vm0, %v28_v0, 0.0 }
   0x3   :  { %11 = vsyncpa [#allocation5], 0  ;;  %32 = vadd.xlane.f32.xlu0 %v31_v1  ;;  %v29_v2 = vld [vmem:[%s1117_s0 + $0x8] sm:$0xff]  ;;  %v902_v4 = vmov 32.0   ;;  %v106_v21 = vld [vmem:[%s1120_s3 + $0x30] sm:$0xff]  ;;  %s905_s19 = smov 48  }
   0x4   :  { %v34_v3 = vsel %vm30_vm0, %v29_v2, 0.0  ;;  %838 = vrcp.f32 %v902_v4  ;;  %v107_v22 = vld [vmem:[%s1120_s3 + $0x38] sm:$0xff]  ;;  %127 = vmatpush.msra.mxu0 %v106_v21  ;;  %v104_v23 = vld [vmem:[%s1120_s3 + $0x20] sm:$0xff]  ;;  %v105_v24 = vld [vmem:[%s1120_s3 + $0x28] sm:$0xff]  ;;  %s906_s20 = smov 32   ;;  %s907_s21 = smov 80  }
   0x5   :  { %150 = vmatpush.msra.mxu1 %v107_v22  ;;  %v102_v27 = vld [vmem:[%s1120_s3 + $0x10] sm:$0xff]  ;;  %v103_v28 = vld [vmem:[%s1120_s3 + $0x18] sm:$0xff]  ;;  %v100_v30 = vld [vmem:[%s1120_s3] sm:$0xff]  ;;  %s908_s22 = smov 112   ;;  %s909_s23 = smov 96   ;;  %vm164_vm8 = vcmask 130048  }
   0x6   :  { %128 = vmatpush.msra.mxu0 %v104_v23  ;;  %v101_v31 = vld [vmem:[%s1120_s3 + $0x8] sm:$0xff]  ;;  %v835_v43 = vld [vmem:[%s1118_s1] ss:$0 sm:$0xff]  ;;  %s903_s1 = smov 16   ;;  %vm216_vm9 = vcmask 64512   ;;  %vm705_vm10 = vcmask 392192  }
   0x7   :  { %151 = vmatpush.msra.mxu1 %v105_v24  ;;  %v836_v46 = vld [vmem:[%s1119_s2] ss:$0 sm:$0xff]  ;;  %s904_s2 = smov 64   ;;  %vm718_vm11 = vcmask 523264   ;;  %s911_s16 = smov [#allocation4]  }
   0x8   :  { %129 = vmatpush.msra.mxu0 %v102_v27  ;;  %s769_s17 = sshll.u32 %s911_s16, 4  ;;  %s770_s17 = int_to_ptr.vmem [resolvable:$true] %s769_s17 }
   0x9   :  { %152 = vmatpush.msra.mxu1 %v103_v28 }
   0xa   :  { %v839_v5 = vpop.eup %838  ;;  %130 = vmatpush.msra.mxu0 %v100_v30 }
   0xb   :  { %35 = vadd.xlane.f32.xlu0 %v34_v3  ;;  %v38_v6 = vmul.f32 32.0, %v839_v5  ;;  %vm42_vm1 = vweird.f32 %v839_v5  ;;  %153 = vmatpush.msra.mxu1 %v101_v31 }
   0xd   :  { %v39_v7 = vsub.f32 1.0, %v38_v6 }
   0xf   :  { %v40_v8 = vmul.f32 %v839_v5, %v39_v7 }
  0x11   :  { %v41_v9 = vadd.f32 %v839_v5, %v40_v8 }
  0x13   :  { %v43_v10 = vsel %vm42_vm1, %v839_v5, %v41_v9 }
  0x76   :  { %v33_v11 = vpop.xlane.xlu0 %32 }
  0x77   :  { %v44_v12 = vmul.f32 %v43_v10, %v33_v11 }
  0x79   :  { %v46_v13 = vsub.f32 %v28_v0, %v44_v12 }
  0x7b   :  { %v48_v14 = vmul.f32 %v46_v13, %v46_v13 }
  0x7d   :  { %v50_v15 = vsel %vm30_vm0, %v48_v14, 0.0 }
  0x7e   :  { %51 = vadd.xlane.f32.xlu1 %v50_v15  ;;  %v36_v16 = vpop.xlane.xlu0 %35 }
  0x7f   :  { %v45_v17 = vmul.f32 %v43_v10, %v36_v16 }
  0x81   :  { %v47_v18 = vsub.f32 %v29_v2, %v45_v17 }
  0x83   :  { %v49_v19 = vmul.f32 %v47_v18, %v47_v18 }
  0x85   :  { %v53_v20 = vsel %vm30_vm0, %v49_v19, 0.0 }
  0x86   :  { %54 = vadd.xlane.f32.xlu1 %v53_v20 }
  0xf1   :  { %v52_v25 = vpop.xlane.xlu1 %51 }
  0xf2   :  { %v56_v26 = vmul.f32 %v52_v25, %v43_v10 }
  0xf4   :  { %v58_v29 = vadd.f32 1e-05, %v56_v26 }
  0xf6   :  { %840 = vrsqrt.f32 %v58_v29  ;;  %vm66_vm3 = vweird.f32 %v58_v29 }
  0xf9   :  { %v55_v32 = vpop.xlane.xlu1 %54 }
  0xfa   :  { %v57_v33 = vmul.f32 %v55_v32, %v43_v10 }
  0xfc   :  { %v841_v34 = vpop.eup %840  ;;  %v59_v35 = vadd.f32 1e-05, %v57_v33 }
  0xfd   :  { %v61_v36 = vmul.f32 %v841_v34, %v58_v29  ;;  %vm67_vm2 = vweird.f32 %v841_v34 }
  0xfe   :  { %842 = vrsqrt.f32 %v59_v35  ;;  %vm68_vm4 = vmor %vm66_vm3, %vm67_vm2  ;;  %vm76_vm6 = vweird.f32 %v59_v35 }
  0xff   :  { %v62_v37 = vmul.f32 %v841_v34, %v61_v36 }
 0x101   :  { %v63_v38 = vmul.f32 0.5, %v62_v37 }
 0x103   :  { %v64_v39 = vsub.f32 1.5, %v63_v38 }
 0x104   :  { %v843_v40 = vpop.eup %842 }
 0x105   :  { %v65_v41 = vmul.f32 %v841_v34, %v64_v39  ;;  %v71_v42 = vmul.f32 %v843_v40, %v59_v35  ;;  %vm77_vm5 = vweird.f32 %v843_v40 }
 0x106   :  { %vm78_vm7 = vmor %vm76_vm6, %vm77_vm5 }
 0x107   :  { %v69_v44 = vsel %vm68_vm4, %v841_v34, %v65_v41  ;;  %v72_v45 = vmul.f32 %v843_v40, %v71_v42 }
 0x108   :  { %v80_v47 = vmul.f32 %v69_v44, %v46_v13 }
 0x109   :  { %v73_v48 = vmul.f32 0.5, %v72_v45 }
 0x10a   :  { %v86_v49 = vmul.f32 %v835_v43, %v80_v47 }
 0x10b   :  { %v74_v50 = vsub.f32 1.5, %v73_v48 }
 0x10c   :  { %v92_v51 = vadd.f32 %v836_v46, %v86_v49 }
 0x10d   :  { %v75_v52 = vmul.f32 %v843_v40, %v74_v50 }
 0x10e   :  { %94 = vst.msk [vmem:[#allocation2] sm:$0xff] %vm30_vm0, %v92_v51 }
 0x10f   :  { %v79_v53 = vsel %vm78_vm7, %v843_v40, %v75_v52 }
 0x110   :  { %v81_v54 = vmul.f32 %v79_v53, %v47_v18 }
 0x112   :  { %v87_v55 = vmul.f32 %v835_v43, %v81_v54 }
 0x114   :  { %v93_v56 = vadd.f32 %v836_v46, %v87_v55 }
 0x115   :  { %v98_v57 = vld [vmem:[#allocation2] sm:$0xff] }
 0x116   :  { %95 = vst.msk [vmem:[#allocation2 + $0x8] sm:$0xff] %vm30_vm0, %v93_v56  ;;  %783 = vmatmul.msk.f32.vlgmr.msra.gmra.mxu0 %vm30_vm0, %v98_v57  ;;  %785 = vmatmul.msk.f32.vlgmr.msra.gmra.mxu1 %vm30_vm0, %v98_v57 }
 0x11d   :  { %v99_v58 = vld [vmem:[#allocation2 + $0x8] sm:$0xff] }
 0x11e   :  { %784 = vmatmul.msk.f32.gmra.mxu0 %vm30_vm0, %v99_v58  ;;  %786 = vmatmul.msk.f32.gmra.mxu1 %vm30_vm0, %v99_v58 }
 0x193   :  { %v132_v59 = vpop.f32.mrf.mxu0  ;;  %v995_v60 = vpop.f32.mrf.mxu1 }
 0x194   :  { %255 = vmatpush.msrb.mxu0 %v995_v60  ;;  %549 = vrot.lane.b32.xlu0 %v132_v59, %s903_s1 }
 0x195   :  { %162 = vrot.lane.b32.xlu2 %v132_v59, %s904_s2  ;;  %287 = vrot.lane.b32.xlu1 %v132_v59, %s905_s19 }
 0x19b   :  { %v135_v61 = vpop.f32.mrf.mxu0  ;;  %v1011_v0 = vpop.f32.mrf.mxu1 }
 0x19c   :  { %315 = vrot.lane.b32.xlu0 %v135_v61, %s905_s19  ;;  %v825_v19 = vpack.i.bf16 %v1011_v0, %v995_v60 }
 0x19d   :  { %447 = vrot.lane.b32.xlu1 %v135_v61, %s906_s20  ;;  %190 = vrot.lane.b32.xlu2 %v135_v61, %s904_s2  ;;  %s913_s2 = smov 8  }
 0x1a5   :  { %547 = vrot.lane.b32.xlu1 %v132_v59, %s907_s21  ;;  %285 = vrot.lane.b32.xlu2 %v132_v59, %s908_s22 }
 0x1ad   :  { %419 = vrot.lane.b32.xlu2 %v132_v59, %s906_s20 }
 0x1b5   :  { %417 = vrot.lane.b32.xlu2 %v132_v59, %s909_s23 }
 0x1bd   :  { %313 = vrot.lane.b32.xlu2 %v135_v61, %s908_s22 }
 0x1c5   :  { %445 = vrot.lane.b32.xlu2 %v135_v61, %s909_s23 }
 0x1cd   :  { %575 = vrot.lane.b32.xlu2 %v135_v61, %s907_s21 }
 0x1ef   :  { %v163_v62 = vpop.permute.xlu2 %162 }
 0x1f0   :  { %787 = vmatpush.xpose.msk.msra.mxu3 %vm164_vm8, %v163_v62 }
 0x1f3   :  { %788 = vmatmul.msk.f32.vlgmr.msra.gmra.mxu3 %vm164_vm8, %v132_v59 }
 0x1f7   :  { %v191_v63 = vpop.permute.xlu2 %190 }
 0x1f8   :  { %789 = vmatpush.xpose.msk.msrb.mxu3 %vm164_vm8, %v191_v63 }
 0x1fb   :  { %790 = vmatmul.msk.f32.vlgmr.msrb.gmra.mxu3 %vm164_vm8, %v135_v61 }
 0x1fc   :  { %278 = vmatpush.msra.mxu3 %v1011_v0 }
 0x1ff   :  { %v286_v1 = vpop.permute.xlu2 %285 }
 0x206   :  { %v550_v2 = vpop.permute.xlu0 %549 }
 0x207   :  { %v420_v3 = vpop.permute.xlu2 %419  ;;  %v288_v4 = vpop.permute.xlu1 %287 }
 0x208   :  { %793 = vmatpush.xpose.msk.msra.mxu2 %vm164_vm8, %v288_v4 }
 0x20b   :  { %794 = vmatmul.msk.f32.vlgmr.msra.gmra.mxu2 %vm164_vm8, %v286_v1 }
 0x20c   :  { %799 = vmatpush.xpose.msk.msrb.mxu2 %vm164_vm8, %v420_v3 }
 0x20e   :  { %v316_v5 = vpop.permute.xlu0 %315 }
 0x20f   :  { %795 = vmatpush.xpose.msk.msrb.mxu3 %vm164_vm8, %v316_v5  ;;  %v448_v6 = vpop.permute.xlu1 %447  ;;  %v418_v7 = vpop.permute.xlu2 %417 }
 0x210   :  { %805 = vmatpush.xpose.msk.msra.mxu2 %vm164_vm8, %v550_v2 }
 0x213   :  { %800 = vmatmul.msk.f32.vlgmr.msrb.gmra.mxu2 %vm164_vm8, %v418_v7 }
 0x217   :  { %v548_v8 = vpop.permute.xlu1 %547  ;;  %v314_v28 = vpop.permute.xlu2 %313 }
 0x21b   :  { %806 = vmatmul.msk.f32.vlgmr.msra.gmra.mxu2 %vm164_vm8, %v548_v8 }
 0x21f   :  { %v446_v30 = vpop.permute.xlu2 %445 }
 0x227   :  { %v576_v31 = vpop.permute.xlu2 %575 }
 0x276   :  { %v186_v9 = vpop.f32.mrf.mxu3 }
 0x277   :  { %v217_v10 = vsel %vm216_vm9, %v186_v9, -inf }
 0x278   :  { %218 = vmax.xlane.f32.xlu1 %v217_v10 }
 0x27e   :  { %v213_v11 = vpop.f32.mrf.mxu3 }
 0x27f   :  { %v220_v12 = vsel %vm216_vm9, %v213_v11, -inf }
 0x280   :  { %221 = vmax.xlane.f32.xlu0 %v220_v12 }
 0x28e   :  { %v310_v13 = vpop.f32.mrf.mxu2 }
 0x28f   :  { %v341_v18 = vsel %vm216_vm9, %v310_v13, -inf }
 0x294   :  { %577 = vrot.lane.b32.xlu0 %v135_v61, %s903_s1 }
 0x296   :  { %v442_v14 = vpop.f32.mrf.mxu2 }
 0x297   :  { %v473_v15 = vsel %vm216_vm9, %v442_v14, -inf }
 0x298   :  { %474 = vmax.xlane.f32.xlu1 %v473_v15 }
 0x29e   :  { %v1027_v16 = vpop.f32.mrf.mxu2 }
 0x29f   :  { %v603_v17 = vsel %vm216_vm9, %v1027_v16, -inf }
 0x2a0   :  { %604 = vmax.xlane.f32.xlu1 %v603_v17 }
 0x2be   :  { %342 = vmax.xlane.f32.xlu0 %v341_v18 }
 0x2d2   :  { %826 = vrot.lane.b32.xlu0 %v825_v19, %s908_s22 }
 0x2da   :  { %623 = vrot.lane.b32.xlu0 %v995_v60, %s907_s21 }
 0x2eb   :  { %v219_v20 = vpop.xlane.xlu1 %218 }
 0x2ec   :  { %v223_v21 = vsub.f32 %v186_v9, %v219_v20 }
 0x2ee   :  { %v225_v22 = vmul.f32 1.442695, %v223_v21 }
 0x2f0   :  { %844 = vpow2.f32 %v225_v22 }
 0x2f3   :  { %v222_v23 = vpop.xlane.xlu0 %221 }
 0x2f4   :  { %v224_v24 = vsub.f32 %v213_v11, %v222_v23 }
 0x2f6   :  { %v845_v25 = vpop.eup %844  ;;  %v227_v26 = vmul.f32 1.442695, %v224_v24 }
 0x2f7   :  { %791 = vmatmul.msk.f32.vlgmr.msrb.gmra.mxu0 %vm216_vm9, %v845_v25  ;;  %v229_v57 = vsel %vm216_vm9, %v845_v25, 0.0 }
 0x2f8   :  { %846 = vpow2.f32 %v227_v26 }
 0x2fe   :  { %v847_v27 = vpop.eup %846 }
 0x2ff   :  { %792 = vmatmul.msk.f32.vlgmr.msra.gmra.mxu3 %vm216_vm9, %v847_v27  ;;  %v232_v39 = vsel %vm216_vm9, %v847_v27, 0.0 }
 0x300   :  { %801 = vmatpush.xpose.msk.msra.mxu3 %vm164_vm8, %v448_v6 }
 0x306   :  { %v578_v29 = vpop.permute.xlu0 %577 }
 0x307   :  { %796 = vmatmul.msk.f32.vlgmr.msrb.gmra.mxu3 %vm164_vm8, %v314_v28 }
 0x308   :  { %807 = vmatpush.xpose.msk.msrb.mxu3 %vm164_vm8, %v578_v29 }
 0x30b   :  { %v475_v48 = vpop.xlane.xlu1 %474 }
 0x30c   :  { %v479_v49 = vsub.f32 %v442_v14, %v475_v48  ;;  %v712_v48 = vld [vmem:[%s1121_s4 + $0x10] sm:$0xff] }
 0x30e   :  { %v481_v50 = vmul.f32 1.442695, %v479_v49  ;;  %v711_v49 = vld [vmem:[%s1121_s4 + $0x8] sm:$0xff] }
 0x30f   :  { %802 = vmatmul.msk.f32.vlgmr.msra.gmra.mxu3 %vm164_vm8, %v446_v30 }
 0x313   :  { %v605_v51 = vpop.xlane.xlu1 %604 }
 0x314   :  { %v609_v52 = vsub.f32 %v1027_v16, %v605_v51  ;;  %v910_v51 = vmov 0.0  }
 0x315   :  { %96 = vst.msk [vmem:[#allocation3] sm:$0xff] %vm30_vm0, %v910_v51 }
 0x316   :  { %v611_v54 = vmul.f32 1.442695, %v609_v52  ;;  %97 = vst.msk [vmem:[#allocation3 + $0x8] sm:$0xff] %vm30_vm0, %v910_v51 }
 0x317   :  { %808 = vmatmul.msk.f32.vlgmr.msrb.gmra.mxu3 %vm164_vm8, %v576_v31 }
 0x331   :  { %v343_v32 = vpop.xlane.xlu0 %342 }
 0x332   :  { %v347_v33 = vsub.f32 %v310_v13, %v343_v32 }
 0x334   :  { %v349_v34 = vmul.f32 1.442695, %v347_v33 }
 0x336   :  { %848 = vpow2.f32 %v349_v34 }
 0x337   :  { %850 = vpow2.f32 %v481_v50  ;;  %v710_v50 = vld [vmem:[%s1121_s4] sm:$0xff] }
 0x338   :  { %852 = vpow2.f32 %v611_v54 }
 0x33c   :  { %v849_v35 = vpop.eup %848 }
 0x33d   :  { %v353_v36 = vsel %vm216_vm9, %v849_v35, 0.0  ;;  %v851_v53 = vpop.eup %850 }
 0x33e   :  { %354 = vadd.xlane.f32.xlu0 %v353_v36  ;;  %v485_v55 = vsel %vm216_vm9, %v851_v53, 0.0  ;;  %v853_v56 = vpop.eup %852 }
 0x33f   :  { %v615_v58 = vsel %vm216_vm9, %v853_v56, 0.0 }
 0x344   :  { %v827_v37 = vpop.permute.xlu0 %826 }
 0x345   :  { %v828_v38 = vunpack.i.l.bf16 %v827_v37  ;;  %v829_v40 = vunpack.i.h.bf16 %v827_v37 }
 0x346   :  { %233 = vadd.xlane.f32.xlu0 %v232_v39 }
 0x347   :  { %383 = vmatpush.msra.mxu0 %v828_v38  ;;  %410 = vmatpush.msrb.mxu1 %v829_v40 }
 0x348   :  { %797 = vmatmul.msk.f32.vlgmr.msra.gmra.mxu0 %vm216_vm9, %v849_v35 }
 0x34c   :  { %v624_v59 = vpop.permute.xlu0 %623 }
 0x374   :  { %v1059_v60 = vpop.f32.mrf.mxu0 }
 0x382   :  { %v1047_v41 = vpop.f32.mrf.mxu3 }
 0x38a   :  { %v338_v42 = vpop.f32.mrf.mxu3 }
 0x38b   :  { %v344_v43 = vsel %vm216_vm9, %v338_v42, -inf }
 0x38c   :  { %345 = vmax.xlane.f32.xlu2 %v344_v43  ;;  %v717_v43 = vld [vmem:[%s1121_s4 + $0x38] sm:$0xff] }
 0x38d   :  { %733 = vmatpush.msrb.mxu2 %v717_v43 }
 0x392   :  { %v470_v44 = vpop.f32.mrf.mxu3 }
 0x393   :  { %v476_v45 = vsel %vm216_vm9, %v470_v44, -inf }
 0x394   :  { %477 = vmax.xlane.f32.xlu2 %v476_v45  ;;  %v715_v45 = vld [vmem:[%s1121_s4 + $0x28] sm:$0xff] }
 0x39a   :  { %v600_v46 = vpop.f32.mrf.mxu3 }
 0x39b   :  { %v606_v47 = vsel %vm216_vm9, %v600_v46, -inf }
 0x39c   :  { %607 = vmax.xlane.f32.xlu1 %v606_v47  ;;  %v713_v47 = vld [vmem:[%s1121_s4 + $0x18] sm:$0xff] }
 0x3ac   :  { %831 = vrot.lane.b32.xlu2 %v825_v19, %s909_s23 }
 0x3b1   :  { %v355_v61 = vpop.xlane.xlu0 %354 }
 0x3b2   :  { %854 = vrcp.f32 %v355_v61 }
 0x3b5   :  { %649 = vrot.lane.b32.xlu1 %v1011_v0, %s907_s21 }
 0x3b8   :  { %v855_v63 = vpop.eup %854 }
 0x3b9   :  { %v234_v20 = vpop.xlane.xlu0 %233 }
 0x3c5   :  { %v385_v62 = vpop.f32.mrf.mxu0 }
 0x3c6   :  { %v415_v0 = vmul.f32 %v855_v63, %v385_v62 }
 0x3d5   :  { %486 = vadd.xlane.f32.xlu2 %v485_v55 }
 0x3dd   :  { %230 = vadd.xlane.f32.xlu2 %v229_v57 }
 0x3df   :  { %616 = vadd.xlane.f32.xlu1 %v615_v58 }
 0x3f8   :  { %679 = vrot.lane.b32.xlu1 %v415_v0, %s903_s1 }
 0x3ff   :  { %v346_v1 = vpop.xlane.xlu2 %345 }
 0x400   :  { %v348_v2 = vsub.f32 %v338_v42, %v346_v1 }
 0x402   :  { %v351_v3 = vmul.f32 1.442695, %v348_v2 }
 0x404   :  { %856 = vpow2.f32 %v351_v3 }
 0x407   :  { %v478_v4 = vpop.xlane.xlu2 %477 }
 0x408   :  { %v480_v5 = vsub.f32 %v470_v44, %v478_v4  ;;  %v716_v44 = vld [vmem:[%s1121_s4 + $0x30] sm:$0xff] }
 0x409   :  { %734 = vmatpush.msrb.mxu2 %v716_v44  ;;  %v708_v4 = vld [vmem:[#allocation3] sm:$0xff] }
 0x40a   :  { %v857_v6 = vpop.eup %856  ;;  %v483_v7 = vmul.f32 1.442695, %v480_v5 }
 0x40b   :  { %798 = vmatmul.msk.f32.vlgmr.msrb.gmra.mxu1 %vm216_vm9, %v857_v6  ;;  %v356_v8 = vsel %vm216_vm9, %v857_v6, 0.0  ;;  %735 = vmatpush.msrb.mxu2 %v715_v45 }
 0x40c   :  { %858 = vpow2.f32 %v483_v7  ;;  %357 = vadd.xlane.f32.xlu0 %v356_v8  ;;  %v709_v7 = vld [vmem:[#allocation3 + $0x8] sm:$0xff]  ;;  %v837_v8 = vld [vmem:[%s1122_s5] ss:$0 sm:$0xff]  ;;  %s912_s5 = smov 128  }
 0x40f   :  { %v832_v9 = vpop.permute.xlu2 %831  ;;  %v608_v10 = vpop.xlane.xlu1 %607 }
 0x410   :  { %v834_v11 = vunpack.i.h.bf16 %v832_v9  ;;  %v833_v12 = vunpack.i.l.bf16 %v832_v9  ;;  %v610_v13 = vsub.f32 %v600_v46, %v608_v10  ;;  %v714_v46 = vld [vmem:[%s1121_s4 + $0x20] sm:$0xff] }
 0x411   :  { %736 = vmatpush.msrb.mxu2 %v714_v46 }
 0x412   :  { %v859_v14 = vpop.eup %858  ;;  %v613_v15 = vmul.f32 1.442695, %v610_v13  ;;  %514 = vmatpush.msrb.mxu0 %v833_v12  ;;  %540 = vmatpush.msra.mxu1 %v834_v11 }
 0x413   :  { %803 = vmatmul.msk.f32.vlgmr.msrb.gmra.mxu0 %vm216_vm9, %v851_v53  ;;  %804 = vmatmul.msk.f32.vlgmr.msra.gmra.mxu1 %vm216_vm9, %v859_v14  ;;  %v488_v16 = vsel %vm216_vm9, %v859_v14, 0.0 }
 0x414   :  { %860 = vpow2.f32 %v613_v15  ;;  %644 = vmatpush.msra.mxu0 %v624_v59  ;;  %489 = vadd.xlane.f32.xlu2 %v488_v16 }
 0x415   :  { %737 = vmatpush.msrb.mxu2 %v713_v47 }
 0x417   :  { %738 = vmatpush.msrb.mxu2 %v712_v48 }
 0x419   :  { %739 = vmatpush.msrb.mxu2 %v711_v49 }
 0x41a   :  { %v861_v17 = vpop.eup %860 }
 0x41b   :  { %809 = vmatmul.msk.f32.vlgmr.msra.gmra.mxu0 %vm216_vm9, %v853_v56  ;;  %v618_v18 = vsel %vm216_vm9, %v861_v17, 0.0  ;;  %740 = vmatpush.msrb.mxu2 %v710_v50 }
 0x41c   :  { %619 = vadd.xlane.f32.xlu0 %v618_v18 }
 0x427   :  { %v650_v19 = vpop.permute.xlu1 %649 }
 0x428   :  { %670 = vmatpush.msrb.mxu1 %v650_v19 }
 0x429   :  { %810 = vmatmul.msk.f32.vlgmr.msrb.gmra.mxu1 %vm216_vm9, %v861_v17 }
 0x448   :  { %v487_v22 = vpop.xlane.xlu2 %486 }
 0x450   :  { %v231_v26 = vpop.xlane.xlu2 %230 }
 0x452   :  { %v617_v27 = vpop.xlane.xlu1 %616 }
 0x46a   :  { %v680_v53 = vpop.permute.xlu1 %679 }
 0x47f   :  { %v358_v21 = vpop.xlane.xlu0 %357 }
 0x480   :  { %862 = vrcp.f32 %v358_v21 }
 0x481   :  { %864 = vrcp.f32 %v487_v22 }
 0x482   :  { %866 = vrcp.f32 %v617_v27 }
 0x486   :  { %v863_v23 = vpop.eup %862 }
 0x487   :  { %v865_v28 = vpop.eup %864  ;;  %v490_v31 = vpop.xlane.xlu2 %489 }
 0x488   :  { %v412_v24 = vpop.f32.mrf.mxu1  ;;  %v867_v32 = vpop.eup %866  ;;  %868 = vrcp.f32 %v490_v31 }
 0x489   :  { %v416_v25 = vmul.f32 %v863_v23, %v412_v24 }
 0x48b   :  { %681 = vrot.lane.b32.xlu1 %v416_v25, %s903_s1  ;;  %s771_s1 = sshll.u32 %s1123_s6, 4  ;;  %s772_s1 = int_to_ptr.hbm [resolvable:$true] %s771_s1 }
 0x48e   :  { %v869_v37 = vpop.eup %868 }
 0x48f   :  { %v620_v35 = vpop.xlane.xlu0 %619 }
 0x490   :  { %v516_v29 = vpop.f32.mrf.mxu0  ;;  %v542_v36 = vpop.f32.mrf.mxu1  ;;  %870 = vrcp.f32 %v620_v35 }
 0x491   :  { %v545_v30 = vmul.f32 %v865_v28, %v516_v29  ;;  %v546_v38 = vmul.f32 %v869_v37, %v542_v36  ;;  %872 = vrcp.f32 %v231_v26 }
 0x492   :  { %874 = vrcp.f32 %v234_v20 }
 0x493   :  { %687 = vrot.lane.b32.xlu2 %v545_v30, %s906_s20 }
 0x496   :  { %v871_v39 = vpop.eup %870 }
 0x497   :  { %v873_v52 = vpop.eup %872 }
 0x498   :  { %v646_v33 = vpop.f32.mrf.mxu0  ;;  %v283_v54 = vmul.f32 %v873_v52, %v1059_v60  ;;  %v875_v61 = vpop.eup %874 }
 0x499   :  { %v675_v34 = vmul.f32 %v867_v32, %v646_v33  ;;  %v284_v63 = vmul.f32 %v875_v61, %v1047_v41 }
 0x49a   :  { %v701_v56 = vsel %vm164_vm8, %v283_v54, %v680_v53 }
 0x49b   :  { %695 = vrot.lane.b32.xlu0 %v675_v34, %s905_s19 }
 0x4a3   :  { %689 = vrot.lane.b32.xlu0 %v546_v38, %s906_s20 }
 0x4a6   :  { %v672_v40 = vpop.f32.mrf.mxu1 }
 0x4a7   :  { %v676_v42 = vmul.f32 %v871_v39, %v672_v40 }
 0x4a9   :  { %697 = vrot.lane.b32.xlu2 %v676_v42, %s905_s19 }
 0x4ed   :  { %v688_v55 = vpop.permute.xlu2 %687 }
 0x4ee   :  { %v703_v57 = vsel %vm30_vm0, %v701_v56, %v688_v55 }
 0x4fd   :  { %v682_v62 = vpop.permute.xlu1 %681 }
 0x4fe   :  { %v702_v0 = vsel %vm164_vm8, %v284_v63, %v682_v62 }
 0x503   :  { %v698_v2 = vpop.permute.xlu2 %697 }
 0x50d   :  { %v696_v58 = vpop.permute.xlu0 %695 }
 0x50e   :  { %v706_v59 = vsel %vm705_vm10, %v703_v57, %v696_v58 }
 0x50f   :  { %811 = vmatmul.msk.f32.vlgmr.msrb.gmra.mxu2 %vm718_vm11, %v706_v59 }
 0x515   :  { %v690_v1 = vpop.permute.xlu0 %689 }
 0x516   :  { %v704_v60 = vsel %vm30_vm0, %v702_v0, %v690_v1 }
 0x517   :  { %v707_v3 = vsel %vm705_vm10, %v704_v60, %v698_v2 }
 0x518   :  { %812 = vmatmul.msk.f32.gmra.mxu2 %vm718_vm11, %v707_v3 }
 0x592   :  { %v742_v5 = vpop.f32.mrf.mxu2 }
 0x593   :  { %v748_v6 = vadd.f32 %v742_v5, %v708_v4 }
 0x595   :  { %750 = vst.msk [vmem:[#allocation3] sm:$0xff] %vm30_vm0, %v748_v6 }
 0x59b   :  { %v745_v9 = vpop.f32.mrf.mxu2 }
 0x59c   :  { %v749_v41 = vadd.f32 %v745_v9, %v709_v7  ;;  %v755_v10 = vld [vmem:[#allocation3] sm:$0xff] }
 0x59d   :  { %v761_v11 = vadd.f32 %v837_v8, %v755_v10 }
 0x59e   :  { %751 = vst.msk [vmem:[#allocation3 + $0x8] sm:$0xff] %vm30_vm0, %v749_v41 }
 0x59f   :  { %763 = vst.msk [vmem:[#allocation4] sm:$0xff] %vm30_vm0, %v761_v11 }
 0x5a5   :  { %v756_v12 = vld [vmem:[#allocation3 + $0x8] sm:$0xff] }
 0x5a6   :  { %v762_v13 = vadd.f32 %v837_v8, %v756_v12 }
 0x5a8   :  { %764 = vst.msk [vmem:[#allocation4 + $0x8] sm:$0xff] %vm30_vm0, %v762_v13 }
 0x5a9   :  { %777 = dma.vmem_to_hbm [thread:$0]  %s770_s17, 256, %s772_s1, [#allocation5], %s912_s5, %s912_s5, %s913_s2  }
 0x5aa   :  { %900 = dma.done.wait [#allocation5], 256  }
 0x5ab   :  { %901 = vsyncadd [#allocation5], 4294967040 }
 0x5ac   :  { %782 = vsyncpa [#allocation5], 1 }

</bundles_post_ra>
